<compile_context>
chip_gen: v6e
topology: v6e:2x2x1
jax: 0.10.0
libtpu: 0.0.40
codegen_flags: <defaults>
</compile_context>

<pallas_src>
import jax
import jax.numpy as jnp
from jax.experimental import pallas as pl
from jax.experimental.pallas import tpu as pltpu


# --------------------------------------------------------------------------
# Kernel
# --------------------------------------------------------------------------
def _critic_kernel(obs_ref, act_ref, w1_ref, b1_ref, w2_ref, b2_ref,
                   w3_ref, b3_ref, out_ref):
    # obs_ref : (B, OBS)        VMEM
    # act_ref : (B, ACT)        VMEM
    # w1_ref  : (D, E*H1)       VMEM   fused layer-1 weights (all members)
    # b1_ref  : (1, E*H1)       VMEM
    # w2_ref  : (E*H1, E*H2)    VMEM   block-diagonal layer-2 weights
    # b2_ref  : (1, E*H2)       VMEM
    # w3_ref  : (E*H2, E)       VMEM   block-diagonal layer-3 weights
    # b3_ref  : (1, E)          VMEM
    # out_ref : (B, E)          VMEM   natural MXU layout (B on sublanes, E on lanes)

    # Layer 1: single K=(OBS+ACT) matmul; the concat never touches HBM.
    x = jnp.concatenate([obs_ref[...], act_ref[...]], axis=-1)          # (B, D)
    h1 = jnp.dot(x, w1_ref[...], preferred_element_type=jnp.float32) + b1_ref[...]
    h1 = jnp.maximum(h1, 0.0)                                           # (B, E*H1)

    # Layer 2: one block-diagonal matmul for all ensemble members.
    h2 = jnp.dot(h1, w2_ref[...], preferred_element_type=jnp.float32) + b2_ref[...]
    h2 = jnp.maximum(h2, 0.0)                                           # (B, E*H2)

    # Layer 3: block-diagonal (E*H2, E) matmul; bias is one VPU add.
    q = jnp.dot(h2, w3_ref[...], preferred_element_type=jnp.float32) + b3_ref[...]
    out_ref[...] = q.astype(out_ref.dtype)                              # (B, E)


# --------------------------------------------------------------------------
# Parameter packing (done once per parameter update, NOT per forward call)
# --------------------------------------------------------------------------
def _block_diag(blocks):
    """blocks: (E, a, b) -> (E*a, E*b) block-diagonal, off-diagonal exactly 0."""
    e, a, b = blocks.shape
    out = jnp.zeros((e * a, e * b), blocks.dtype)
    for i in range(e):                       # e is a small static constant
        out = out.at[i * a:(i + 1) * a, i * b:(i + 1) * b].set(blocks[i])
    return out


def pack_params(params):
    """Repack torch-layout ensemble params into the fused kernel layout."""
    w1, b1 = params["w1"], params["b1"]      # (E, D, H1), (E, 1, H1)
    w2, b2 = params["w2"], params["b2"]      # (E, H1, H2), (E, 1, H2)
    w3, b3 = params["w3"], params["b3"]      # (E, H2, 1), (E, 1, 1)
    e, d, h1 = w1.shape
    h2 = w2.shape[-1]

    packed = {
        # member-major lane ordering everywhere: member i owns lanes [i*H, (i+1)*H)
        "w1": jnp.transpose(w1, (1, 0, 2)).reshape(d, e * h1).astype(jnp.float32),
        "b1": b1.reshape(1, e * h1).astype(jnp.float32),
        "w2": _block_diag(w2.astype(jnp.float32)),          # (E*H1, E*H2)
        "b2": b2.reshape(1, e * h2).astype(jnp.float32),
        "w3": _block_diag(w3.astype(jnp.float32)),          # (E*H2, E)
        "b3": b3.reshape(1, e).astype(jnp.float32),
        "ensemble_size": e,
    }
    return packed


# --------------------------------------------------------------------------
# Forward wrapper
# --------------------------------------------------------------------------
def critic_forward(obs, action, packed):
    """Ensemble critic forward (encoder=None path).

    obs:    (B, obs_dim) float32
    action: (B, action_dim) float32
    packed: output of pack_params()

    Returns q values of shape (ensemble_size, B) — matches PyTorch
    `self.q_networks(x).squeeze(-1)`.
    """
    obs = obs.astype(jnp.float32)
    action = action.astype(jnp.float32)
    batch = obs.shape[0]
    e = packed["ensemble_size"]

    vmem = pl.BlockSpec(memory_space=pltpu.MemorySpace.VMEM)

    q_be = pl.pallas_call(
        _critic_kernel,
        out_shape=jax.ShapeDtypeStruct((batch, e), jnp.float32),
        in_specs=[vmem] * 8,
        out_specs=vmem,
    )(obs, action,
      packed["w1"], packed["b1"],
      packed["w2"], packed["b2"],
      packed["w3"], packed["b3"])

    # Single transpose to the contractual (E, B) layout.
    return jnp.transpose(q_be)


# --------------------------------------------------------------------------
# Synthetic init + pure-JAX reference
# --------------------------------------------------------------------------
def init_params(key, obs_dim, action_dim, hidden_dims, ensemble_size):
    """Deterministic synthetic parameter init (uniform, like torch default)."""
    d = obs_dim + action_dim
    h1, h2 = hidden_dims
    dims = [(d, h1), (h1, h2), (h2, 1)]
    params = {}
    for li, (din, dout) in enumerate(dims, start=1):
        key, kw, kb = jax.random.split(key, 3)
        bound = 1.0 / jnp.sqrt(float(din))
        params[f"w{li}"] = jax.random.uniform(
            kw, (ensemble_size, din, dout), jnp.float32, -bound, bound)
        params[f"b{li}"] = jax.random.uniform(
            kb, (ensemble_size, 1, dout), jnp.float32, -bound, bound)
    return params


def critic_reference(obs, action, params):
    """Pure-JAX reference for correctness checking."""
    x = jnp.concatenate([obs, action], axis=-1)                          # (B, D)
    h = jnp.maximum(jnp.einsum("bd,edh->ebh", x, params["w1"]) + params["b1"], 0.0)
    h = jnp.maximum(jnp.einsum("ebd,edh->ebh", h, params["w2"]) + params["b2"], 0.0)
    q = jnp.einsum("ebd,edh->ebh", h, params["w3"]) + params["b3"]
    return jnp.squeeze(q, axis=-1)                                       # (E, B)


# --------------------------------------------------------------------------
# Self-test
# --------------------------------------------------------------------------
if __name__ == "__main__":
    # Small shapes consistent with the module: encoder=None, input_dim=obs_dim.
    B = 2              # batch
    OBS_DIM = 32       # pre-encoded observation features (input_dim)
    ACTION_DIM = 8
    HIDDEN = (32, 32)  # hidden_dims
    E = 2              # ensemble_size

    key = jax.random.PRNGKey(0)
    k_obs, k_act, k_par = jax.random.split(key, 3)
    obs = jax.random.normal(k_obs, (B, OBS_DIM), jnp.float32)
    action = jax.random.normal(k_act, (B, ACTION_DIM), jnp.float32)
    params = init_params(k_par, OBS_DIM, ACTION_DIM, HIDDEN, E)

    packed = pack_params(params)              # one-time repack (not per call)
    q = critic_forward(obs, action, packed)
    q = jax.block_until_ready(q)

    q_ref = critic_reference(obs, action, params)
    assert q.shape == (E, B), q.shape
    assert jnp.allclose(q, q_ref, atol=1e-4, rtol=1e-4), (q, q_ref)

    print("KERNEL_OK")
</pallas_src>

<mosaic_0001>
module attributes {stable_mosaic.version = 11 : i64} {
  func.func @_critic_kernel(%arg0: memref<2x32xf32, #tpu.memory_space<vmem>>, %arg1: memref<2x8xf32, #tpu.memory_space<vmem>>, %arg2: memref<40x64xf32, #tpu.memory_space<vmem>>, %arg3: memref<1x64xf32, #tpu.memory_space<vmem>>, %arg4: memref<64x64xf32, #tpu.memory_space<vmem>>, %arg5: memref<1x64xf32, #tpu.memory_space<vmem>>, %arg6: memref<64x2xf32, #tpu.memory_space<vmem>>, %arg7: memref<1x2xf32, #tpu.memory_space<vmem>>, %arg8: memref<2x2xf32, #tpu.memory_space<vmem>>) attributes {dimension_semantics = [], scalar_prefetch = 0 : i64, scratch_operands = 0 : i64, tpu.core_type = #tpu.core_type<tc>} {
    %c0 = arith.constant 0 : index
    %c0_0 = arith.constant 0 : index
    %0 = vector.load %arg0[%c0, %c0_0] : memref<2x32xf32, #tpu.memory_space<vmem>>, vector<2x32xf32>
    %c0_1 = arith.constant 0 : index
    %c0_2 = arith.constant 0 : index
    %1 = vector.load %arg1[%c0_1, %c0_2] : memref<2x8xf32, #tpu.memory_space<vmem>>, vector<2x8xf32>
    %2 = tpu.concatenate %0, %1 in 1 : vector<2x32xf32>, vector<2x8xf32> -> vector<2x40xf32>
    %c0_3 = arith.constant 0 : index
    %c0_4 = arith.constant 0 : index
    %3 = vector.load %arg2[%c0_3, %c0_4] : memref<40x64xf32, #tpu.memory_space<vmem>>, vector<40x64xf32>
    %cst = arith.constant dense<0.000000e+00> : vector<2x64xf32>
    %4 = tpu.matmul %2, %3, %cst {dimension_numbers = #tpu.dot_dimension_numbers<[1], [0], [0], [1], [0, 0, 1, 1], [], []>} : vector<2x40xf32>, vector<40x64xf32>, vector<2x64xf32> -> vector<2x64xf32>
    %c0_5 = arith.constant 0 : index
    %c0_6 = arith.constant 0 : index
    %5 = vector.load %arg3[%c0_5, %c0_6] : memref<1x64xf32, #tpu.memory_space<vmem>>, vector<1x64xf32>
    %6 = vector.broadcast %5 : vector<1x64xf32> to vector<2x64xf32>
    %7 = arith.addf %4, %6 : vector<2x64xf32>
    %cst_7 = arith.constant 0.000000e+00 : f32
    %8 = vector.broadcast %cst_7 : f32 to vector<2x64xf32>
    %9 = arith.maximumf %7, %8 : vector<2x64xf32>
    %c0_8 = arith.constant 0 : index
    %c0_9 = arith.constant 0 : index
    %10 = vector.load %arg4[%c0_8, %c0_9] : memref<64x64xf32, #tpu.memory_space<vmem>>, vector<64x64xf32>
    %cst_10 = arith.constant dense<0.000000e+00> : vector<2x64xf32>
    %11 = tpu.matmul %9, %10, %cst_10 {dimension_numbers = #tpu.dot_dimension_numbers<[1], [0], [0], [1], [0, 0, 1, 1], [], []>} : vector<2x64xf32>, vector<64x64xf32>, vector<2x64xf32> -> vector<2x64xf32>
    %c0_11 = arith.constant 0 : index
    %c0_12 = arith.constant 0 : index
    %12 = vector.load %arg5[%c0_11, %c0_12] : memref<1x64xf32, #tpu.memory_space<vmem>>, vector<1x64xf32>
    %13 = vector.broadcast %12 : vector<1x64xf32> to vector<2x64xf32>
    %14 = arith.addf %11, %13 : vector<2x64xf32>
    %cst_13 = arith.constant 0.000000e+00 : f32
    %15 = vector.broadcast %cst_13 : f32 to vector<2x64xf32>
    %16 = arith.maximumf %14, %15 : vector<2x64xf32>
    %c0_14 = arith.constant 0 : index
    %c0_15 = arith.constant 0 : index
    %17 = vector.load %arg6[%c0_14, %c0_15] : memref<64x2xf32, #tpu.memory_space<vmem>>, vector<64x2xf32>
    %cst_16 = arith.constant dense<0.000000e+00> : vector<2x2xf32>
    %18 = tpu.matmul %16, %17, %cst_16 {dimension_numbers = #tpu.dot_dimension_numbers<[1], [0], [0], [1], [0, 0, 1, 1], [], []>} : vector<2x64xf32>, vector<64x2xf32>, vector<2x2xf32> -> vector<2x2xf32>
    %c0_17 = arith.constant 0 : index
    %c0_18 = arith.constant 0 : index
    %19 = vector.load %arg7[%c0_17, %c0_18] : memref<1x2xf32, #tpu.memory_space<vmem>>, vector<1x2xf32>
    %20 = vector.broadcast %19 : vector<1x2xf32> to vector<2x2xf32>
    %21 = arith.addf %18, %20 : vector<2x2xf32>
    %c0_19 = arith.constant 0 : index
    %c0_20 = arith.constant 0 : index
    %22 = vector.load %arg8[%c0_19, %c0_20] : memref<2x2xf32, #tpu.memory_space<vmem>>, vector<2x2xf32>
    tpu.vector_store %arg8[%c0_19, %c0_20], %21 {strides = array<i32>} : memref<2x2xf32, #tpu.memory_space<vmem>>, vector<2x2xf32>,
    return
  }
}

</mosaic_0001>

<bundles_post_ra>
// kernel: tpu_custom_call.1
= control target key start
LH: loop header
LB: loop body
LE: loop exit
PB: predicated region body
PF: predicated region fallthrough
CT: control target
= control target key end

     0   :  { %13 = vsyncpa [#allocation3], 0  ;;  %s616_s0 = inlined_call_operand.vmem [shape: f32[2,32], index: 0, kind: input, shape index: {}]   ;;  %s617_s1 = inlined_call_operand.vmem [shape: f32[2,8], index: 1, kind: input, shape index: {}]   ;;  %s618_s2 = inlined_call_operand.hbm [shape: f32[40,64], index: 2, kind: input, shape index: {}]   ;;  %s619_s3 = inlined_call_operand.vmem [shape: f32[1,64], index: 3, kind: input, shape index: {}]   ;;  %s620_s4 = inlined_call_operand.vmem [shape: f32[64,64], index: 4, kind: input, shape index: {}]   ;;  %s621_s5 = inlined_call_operand.vmem [shape: f32[1,64], index: 5, kind: input, shape index: {}]   ;;  %s622_s6 = inlined_call_operand.vmem [shape: f32[64,2], index: 6, kind: input, shape index: {}]   ;;  %s623_s7 = inlined_call_operand.vmem [shape: f32[1,2], index: 7, kind: input, shape index: {}]   ;;  %s624_s8 = inlined_call_operand.hbm [shape: f32[2,2], index: 8, kind: output, shape index: {}]  }
   0x1   :  { %14 = vsyncpa [#allocation4], 0  ;;  %s466_s27 = smov [#allocation2]  }
   0x2   :  { %s24_s28 = sshll.u32 %s466_s27, 4  ;;  %s25_s28 = int_to_ptr.vmem [resolvable:$true] %s24_s28 }
   0x3   :  { %s430_s29 = scalar_lea.vmem %s25_s28, 640  ;;  %p435_p1 = scmp.lt.s32.totalorder %s25_s28, %s25_s28 }
   0x4   :  { %p431_p0 = scmp.ne.s32.totalorder %s25_s28, %s430_s29  ;;  %p436_p2 = scmp.lt.s32.totalorder %s430_s29, %s430_s29 }
   0x6   :  { %p437_p3 = por %p436_p2, %p435_p1 }
   0x8   :  { %p438_p4 = pnand %p437_p3, %p431_p0 }
   0xa   :  { %441 = shalt.err (!%p438_p4)
}
   0xb   :  { %s467_s30 = smov 128   ;;  %s468_s9 = smov 8  }
   0xc   :  { %30 = dma.hbm_to_vmem [thread:$0]  %s618_s2, 640, %s25_s28, [#allocation3], %s467_s30, %s467_s30, %s468_s9  }
   0xd   :  { %462 = dma.done.wait [#allocation3], 640  }
   0xe   :  { %463 = vsyncadd [#allocation3], 4294966656  ;;  %v469_v0 = vmov 0.0   ;;  %vm470_vm0 = vmmov 0   ;;  %v45_v1 = vld [vmem:[%s617_s1] sm:$0x3] }
   0xf   :  { %364 = vmatprep.subr.mxu0 %v469_v0  ;;  %374 = vmatprep.mubr.msk.f32.mxu0 %vm470_vm0, %v469_v0  ;;  %v56_v2 = vld [vmem:[#allocation2 + $0x20] sm:$0xff]  ;;  %v55_v3 = vld [vmem:[#allocation2 + $0x18] sm:$0xff]  ;;  %s471_s2 = smov 32   ;;  %v54_v4 = vld [vmem:[#allocation2 + $0x10] sm:$0xff]  ;;  %vm50_vm1 = vcmask 261120   ;;  %vm64_vm2 = vcmask 326656  }
  0x10   :  { %377 = vmatprep.subr.mxu1 %v469_v0  ;;  %393 = vmatprep.mubr.msk.f32.mxu1 %vm470_vm0, %v469_v0  ;;  %v146_v5 = vld [vmem:[%s620_s4 + $0x38] sm:$0xff]  ;;  %v145_v6 = vld [vmem:[%s620_s4 + $0x30] sm:$0xff]  ;;  %v53_v7 = vld [vmem:[#allocation2 + $0x8] sm:$0xff]  ;;  %vm154_vm3 = vcmask 523264   ;;  %s472_s26 = smov [#allocation5]   ;;  %vm317_vm4 = vcmask 9216  }
  0x11   :  { %47 = vrot.lane.b32.xlu0 %v45_v1, %s471_s2  ;;  %365 = vmatpush3.msra.mxu0 %v56_v2  ;;  %v144_v8 = vld [vmem:[%s620_s4 + $0x28] sm:$0xff]  ;;  %v52_v9 = vld [vmem:[#allocation2] sm:$0xff]  ;;  %v142_v11 = vld [vmem:[%s620_s4 + $0x18] sm:$0xff]  ;;  %s325_s27 = sshll.u32 %s472_s26, 4  ;;  %s326_s27 = int_to_ptr.vmem [resolvable:$true] %s325_s27 }
  0x12   :  { %366 = vmatprep.subr.mxu0 %v469_v0  ;;  %378 = vmatpush3.msra.mxu1 %v146_v5  ;;  %v143_v10 = vld [vmem:[%s620_s4 + $0x20] sm:$0xff]  ;;  %v141_v15 = vld [vmem:[%s620_s4 + $0x10] sm:$0xff]  ;;  %v140_v16 = vld [vmem:[%s620_s4 + $0x8] sm:$0xff]  ;;  %p447_p6 = scmp.lt.s32.totalorder %s326_s27, %s326_s27 }
  0x13   :  { %367 = vmatpush3.msra.mxu0 %v55_v3  ;;  %379 = vmatprep.subr.mxu1 %v469_v0  ;;  %v44_v12 = vld [vmem:[%s616_s0] sm:$0x3]  ;;  %v236_v18 = vld [vmem:[%s622_s6 + $0x38] sm:$0xff]  ;;  %v235_v19 = vld [vmem:[%s622_s6 + $0x30] sm:$0xff] }
  0x14   :  { %368 = vmatprep.subr.mxu0 %v469_v0  ;;  %380 = vmatpush3.msra.mxu1 %v145_v6  ;;  %v139_v17 = vld [vmem:[%s620_s4] sm:$0xff]  ;;  %v234_v20 = vld [vmem:[%s622_s6 + $0x28] sm:$0xff]  ;;  %v232_v22 = vld [vmem:[%s622_s6 + $0x18] sm:$0xff] }
  0x15   :  { %369 = vmatpush3.msra.mxu0 %v54_v4  ;;  %381 = vmatprep.subr.mxu1 %v469_v0  ;;  %v233_v21 = vld [vmem:[%s622_s6 + $0x20] sm:$0xff]  ;;  %v231_v28 = vld [vmem:[%s622_s6 + $0x10] sm:$0xff]  ;;  %v230_v29 = vld [vmem:[%s622_s6 + $0x8] sm:$0xff] }
  0x16   :  { %370 = vmatprep.subr.mxu0 %v469_v0  ;;  %382 = vmatpush3.msra.mxu1 %v144_v8  ;;  %v334_v23 = vld [vmem:[%s619_s3] ss:$0 sm:$0xff] }
  0x17   :  { %371 = vmatpush3.msra.mxu0 %v53_v7  ;;  %383 = vmatprep.subr.mxu1 %v469_v0  ;;  %v229_v30 = vld [vmem:[%s622_s6] sm:$0xff]  ;;  %s442_s6 = scalar_lea.vmem %s326_s27, 32 }
  0x18   :  { %372 = vmatprep.subr.mxu0 %v469_v0  ;;  %384 = vmatpush3.msra.mxu1 %v143_v10  ;;  %v336_v31 = vld [vmem:[%s621_s5] ss:$0 sm:$0xff]  ;;  %p443_p5 = scmp.ne.s32.totalorder %s326_s27, %s442_s6  ;;  %p448_p7 = scmp.lt.s32.totalorder %s442_s6, %s442_s6 }
  0x19   :  { %373 = vmatpush3.msra.mxu0 %v52_v9  ;;  %385 = vmatprep.subr.mxu1 %v469_v0  ;;  %v338_v36 = vld [vmem:[%s623_s7] ss:$0 sm:$0xff] }
  0x1a   :  { %396 = vmatprep.subr.mxu0 %v469_v0  ;;  %386 = vmatpush3.msra.mxu1 %v142_v11  ;;  %p449_p8 = por %p448_p7, %p447_p6 }
  0x1b   :  { %387 = vmatprep.subr.mxu1 %v469_v0 }
  0x1c   :  { %388 = vmatpush3.msra.mxu1 %v141_v15  ;;  %p450_p9 = pnand %p449_p8, %p443_p5 }
  0x1d   :  { %389 = vmatprep.subr.mxu1 %v469_v0 }
  0x1e   :  { %390 = vmatpush3.msra.mxu1 %v140_v16 }
  0x1f   :  { %391 = vmatprep.subr.mxu1 %v469_v0 }
  0x20   :  { %392 = vmatpush3.msra.mxu1 %v139_v17 }
  0x83   :  { %v48_v13 = vpop.permute.xlu0 %47 }
  0x84   :  { %v51_v14 = vsel %vm50_vm1, %v44_v12, %v48_v13 }
  0x85   :  { %375 = vmatmul.mubr.msk.f32.vlgmr.msra.gmra.mxu0 %vm64_vm2, %v51_v14 }
  0x86   :  { %412 = vmatprep.mubr.msk.f32.mxu0 %vm470_vm0, %v469_v0  ;;  %397 = vmatpush3.msra.mxu0 %v236_v18 }
  0x87   :  { %398 = vmatprep.subr.mxu0 %v469_v0 }
  0x88   :  { %399 = vmatpush3.msra.mxu0 %v235_v19 }
  0x89   :  { %400 = vmatprep.subr.mxu0 %v469_v0 }
  0x8a   :  { %401 = vmatpush3.msra.mxu0 %v234_v20 }
  0x8b   :  { %402 = vmatprep.subr.mxu0 %v469_v0 }
  0x8c   :  { %403 = vmatpush3.msra.mxu0 %v233_v21 }
  0x8d   :  { %404 = vmatprep.subr.mxu0 %v469_v0 }
  0x8e   :  { %405 = vmatpush3.msra.mxu0 %v232_v22 }
  0x8f   :  { %406 = vmatprep.subr.mxu0 %v469_v0 }
  0x90   :  { %407 = vmatpush3.msra.mxu0 %v231_v28 }
  0x91   :  { %408 = vmatprep.subr.mxu0 %v469_v0 }
  0x92   :  { %409 = vmatpush3.msra.mxu0 %v230_v29 }
  0x93   :  { %410 = vmatprep.subr.mxu0 %v469_v0 }
  0x94   :  { %411 = vmatpush3.msra.mxu0 %v229_v30 }
 0x145   :  { %v134_v24 = vpop.f32.mrf.mxu0 }
 0x146   :  { %v135_v25 = vadd.f32 %v334_v23, %v134_v24 }
 0x147   :  { %v376_v26 = vpop.f32.mrf.mxu0 }
 0x148   :  { %v138_v27 = vmax.f32 %v135_v25, 0.0 }
 0x14a   :  { %394 = vmatmul.mubr.msk.f32.vlgmr.msra.gmra.mxu1 %vm154_vm3, %v138_v27 }
 0x20a   :  { %v224_v32 = vpop.f32.mrf.mxu1 }
 0x20b   :  { %v225_v33 = vadd.f32 %v336_v31, %v224_v32 }
 0x20c   :  { %v395_v34 = vpop.f32.mrf.mxu1 }
 0x20d   :  { %v228_v35 = vmax.f32 %v225_v33, 0.0 }
 0x20f   :  { %413 = vmatmul.mubr.msk.f32.vlgmr.msra.gmra.mxu0 %vm154_vm3, %v228_v35 }
 0x2cf   :  { %v313_v37 = vpop.f32.mrf.mxu0 }
 0x2d0   :  { %v314_v38 = vadd.f32 %v338_v36, %v313_v37 }
 0x2d1   :  { %v414_v39 = vpop.f32.mrf.mxu0 }
 0x2d2   :  { %318 = vst.msk [vmem:[#allocation5] sm:$0x3] %vm317_vm4, %v314_v38 }
 0x2d3   :  { %453 = shalt.err (!%p450_p9)
}
 0x2d4   :  { %328 = dma.vmem_to_hbm [thread:$0]  %s326_s27, 32, %s624_s8, [#allocation4]  }
 0x2d5   :  { %464 = dma.done.wait [#allocation4], 32  }
 0x2d6   :  { %465 = vsyncadd [#allocation4], 4294967264 }
 0x2d7   :  { %332 = vsyncpa [#allocation3], 1 }
 0x2d8   :  { %333 = vsyncpa [#allocation4], 1 }

</bundles_post_ra>
